<compile_context>
chip_gen: v5e
topology: v5e:2x2
jax: 0.10.0
libtpu: 0.0.40
codegen_flags: <defaults>
</compile_context>

<pallas_src>
import functools

import jax
import jax.numpy as jnp
from jax import lax
from jax.experimental import pallas as pl
from jax.experimental.pallas import tpu as pltpu

_LANE = 128
_ACC_ROWS = 8                     # vreg sublane count -> (8, 128) accumulator slabs
_TILE_ROWS = 4096                 # rows per grid step (2 MiB f32 per operand block)
_VMEM_LIMIT = 40 * 1024 * 1024    # block buffers + elementwise temporaries; < v7x 64 MiB physical


def _iou_partials_kernel(*refs, weighted, tile_rows, steps, valid_rows, mask_tail):
    if weighted:
        x_ref, t_ref, w_ref, out_ref = refs
    else:
        x_ref, t_ref, out_ref = refs
        w_ref = None

    c = pl.program_id(0)   # core / split axis
    i = pl.program_id(1)   # reduction axis ("arbitrary"); out block resident across it

    @pl.when(i == 0)
    def _():
        out_ref[...] = jnp.zeros(out_ref.shape, jnp.float32)

    x = x_ref[...].astype(jnp.float32)
    t = t_ref[...].astype(jnp.float32)
    prod = x * t
    if weighted:
        prod = prod * w_ref[...].astype(jnp.float32)
    tot = x + t

    def accumulate(p, s):
        # Keep this exact ordering: each (_ACC_ROWS, _LANE) group is one f32
        # vreg, so the fold is pure VPU vreg adds (no XLU cross-lane work).
        out_ref[0, 0] += p.reshape(-1, _ACC_ROWS, _LANE).sum(axis=0)
        out_ref[0, 1] += s.reshape(-1, _ACC_ROWS, _LANE).sum(axis=0)

    if mask_tail:
        # Rows past the real extent come from an edge-block (or clamped
        # overshoot-block) DMA whose trailing VMEM contents are unspecified.
        # The select below (a `where` AFTER the compute, not a multiply) forces
        # their contribution to exactly 0.  Do not remove or reorder garbage
        # into an unmasked accumulation.
        base = (c * steps + i) * tile_rows
        needs_mask = base + tile_rows > valid_rows

        @pl.when(needs_mask)
        def _():
            row_id = base + lax.broadcasted_iota(jnp.int32, (tile_rows, _LANE), 0)
            keep = row_id < valid_rows
            accumulate(jnp.where(keep, prod, 0.0), jnp.where(keep, tot, 0.0))

        @pl.when(jnp.logical_not(needs_mask))
        def _():
            accumulate(prod, tot)
    else:
        accumulate(prod, tot)


def _cdiv(a, b):
    return -(-a // b)


def _round_up(a, b):
    return _cdiv(a, b) * b


def _as_rows(a):
    """Flatten to (rows, 128); zero-pad only for ragged / tiny inputs (exact)."""
    flat = a.reshape(-1)
    n = flat.shape[0]
    target = max(_round_up(n, _LANE), _ACC_ROWS * _LANE)
    if target != n:
        flat = jnp.pad(flat, (0, target - n))   # zeros add 0 to both sums
    return flat.reshape(target // _LANE, _LANE)


def _num_tensorcores():
    """TensorCores per chip: 2 on v7x-style megacore parts, else 1."""
    try:
        kind = jax.devices()[0].device_kind.lower()
    except Exception:
        return 1
    return 2 if ("v7" in kind or "7x" in kind) else 1


def iou_loss(inputs, targets, weights=None, smooth=1.0):
    """Pallas equivalent of IoULoss.forward. Returns a float32 scalar."""
    weighted = weights is not None
    # Note: no wrapper-side dtype pre-cast — sub-32-bit inputs stream their
    # native bytes over HBM and are widened in-kernel (free under the DMA).
    args = [_as_rows(inputs), _as_rows(targets)]
    if weighted:
        args.append(_as_rows(weights))

    rows = args[0].shape[0]
    tile_rows = min(_TILE_ROWS, (rows // _ACC_ROWS) * _ACC_ROWS)
    total_blocks = _cdiv(rows, tile_rows)

    # Split the reduction across TensorCores only where two exist; on single-TC
    # chips a forced split just creates a clamped overshoot step (wasted
    # re-DMA of the last block) when total_blocks is odd.
    num_splits = 2 if (_num_tensorcores() == 2 and total_blocks >= 2) else 1
    steps = _cdiv(total_blocks, num_splits)
    mask_tail = (num_splits * steps * tile_rows) != rows

    def data_map(c, i):
        # Clamp so overshoot steps (odd block counts with a 2-way split) never
        # DMA out of bounds; their contribution is fully masked in-kernel.
        return (jnp.minimum(c * steps + i, total_blocks - 1), 0)

    data_spec = pl.BlockSpec((tile_rows, _LANE), data_map)
    out_spec = pl.BlockSpec((1, 2, _ACC_ROWS, _LANE), lambda c, i: (c, 0, 0, 0))

    if num_splits == 2:
        # Guarantee the 2-TC split on megacore parts.
        dim_sem = (pltpu.CORE_PARALLEL, pltpu.ARBITRARY)
    else:
        dim_sem = (pltpu.ARBITRARY, pltpu.ARBITRARY)

    n_elems = inputs.size
    bytes_accessed = (sum(a.size * a.dtype.itemsize for a in args)
                      + num_splits * 2 * _ACC_ROWS * _LANE * 4)
    cost = pl.CostEstimate(flops=(4 if weighted else 3) * n_elems,
                           transcendentals=0,
                           bytes_accessed=bytes_accessed)

    kernel = functools.partial(
        _iou_partials_kernel,
        weighted=weighted, tile_rows=tile_rows, steps=steps,
        valid_rows=rows, mask_tail=mask_tail)

    partials = pl.pallas_call(
        kernel,
        out_shape=jax.ShapeDtypeStruct((num_splits, 2, _ACC_ROWS, _LANE), jnp.float32),
        grid_spec=pltpu.PrefetchScalarGridSpec(
            num_scalar_prefetch=0,
            grid=(num_splits, steps),
            in_specs=[data_spec] * len(args),
            out_specs=out_spec,
        ),
        compiler_params=pltpu.CompilerParams(
            dimension_semantics=dim_sem,
            vmem_limit_bytes=_VMEM_LIMIT),
        cost_estimate=cost,
    )(*args)

    smooth = jnp.float32(smooth)
    intersection = jnp.sum(partials[:, 0])
    total = jnp.sum(partials[:, 1])
    union = total - intersection
    return 1.0 - (intersection + smooth) / (union + smooth)


def iou_loss_ref(inputs, targets, weights=None, smooth=1.0):
    x = inputs.reshape(-1).astype(jnp.float32)
    t = targets.reshape(-1).astype(jnp.float32)
    if weights is not None:
        w = weights.reshape(-1).astype(jnp.float32)
        inter = jnp.sum(x * t * w)
    else:
        inter = jnp.sum(x * t)
    total = jnp.sum(x + t)
    union = total - inter
    return 1.0 - (inter + smooth) / (union + smooth)


if __name__ == "__main__":
    key = jax.random.PRNGKey(0)

    def check(shape, with_weights, seed_offset, dtype=jnp.float32):
        k1, k2, k3 = jax.random.split(jax.random.fold_in(key, seed_offset), 3)
        x = jax.random.uniform(k1, shape, dtype=jnp.float32).astype(dtype)
        t = (jax.random.uniform(k2, shape) > 0.5).astype(dtype)
        w = (jax.random.uniform(k3, shape, dtype=jnp.float32).astype(dtype)
             if with_weights else None)
        got = jax.block_until_ready(iou_loss(x, t, w, smooth=1.0))
        want = iou_loss_ref(x, t, w, smooth=1.0)
        assert jnp.allclose(got, want, rtol=1e-4, atol=1e-5), (shape, with_weights, got, want)

    # NCHW shapes like the PyTorch module's segmentation outputs.
    check((2, 4, 16, 16), False, 0)                        # small, single block, unweighted
    check((2, 4, 16, 16), True, 1)                         # small, single block, weighted
    check((2, 8, 256, 256), True, 2)                       # multi-step, exact tiling
    check((3, 5, 17, 19), True, 3)                         # ragged: lane pad + masked tail block
    check((2, 4, 16, 16), True, 4, dtype=jnp.bfloat16)     # in-kernel widening, no wrapper pre-cast

    print("KERNEL_OK")
</pallas_src>

<mosaic_0001>
module attributes {stable_mosaic.version = 11 : i64} {
  func.func @_iou_partials_kernel(%arg0: i32, %arg1: i32, %arg2: memref<16x128xf32, #tpu.memory_space<vmem>>, %arg3: memref<16x128xf32, #tpu.memory_space<vmem>>, %arg4: memref<1x2x8x128xf32, #tpu.memory_space<vmem>>) attributes {dimension_semantics = [#tpu.dimension_semantics<arbitrary>, #tpu.dimension_semantics<arbitrary>], iteration_bounds = array<i64: 1, 1>, scalar_prefetch = 0 : i64, scratch_operands = 0 : i64, tpu.core_type = #tpu.core_type<tc>, window_params = [{transform_indices = @transform_0, window_bounds = array<i64: 16, 128>}, {transform_indices = @transform_1, window_bounds = array<i64: 16, 128>}, {transform_indices = @transform_2, window_bounds = array<i64: 1, 2, 8, 128>}]} {
    %c0_i32 = arith.constant 0 : i32
    %0 = arith.cmpi eq, %arg1, %c0_i32 : i32
    %1 = arith.extui %0 : i1 to i32
    %c0_i32_0 = arith.constant 0 : i32
    %2 = arith.cmpi ne, %1, %c0_i32_0 : i32
    scf.if %2 {
      %cst_20 = arith.constant 0.000000e+00 : f32
      %23 = vector.broadcast %cst_20 : f32 to vector<1x2x8x128xf32>
      %c0_21 = arith.constant 0 : index
      %c0_22 = arith.constant 0 : index
      %c0_23 = arith.constant 0 : index
      %c0_24 = arith.constant 0 : index
      %24 = vector.load %arg4[%c0_21, %c0_22, %c0_23, %c0_24] : memref<1x2x8x128xf32, #tpu.memory_space<vmem>>, vector<1x2x8x128xf32>
      tpu.vector_store %arg4[%c0_21, %c0_22, %c0_23, %c0_24], %23 {strides = array<i32>} : memref<1x2x8x128xf32, #tpu.memory_space<vmem>>, vector<1x2x8x128xf32>,
    } else {
    }
    %c0 = arith.constant 0 : index
    %c0_1 = arith.constant 0 : index
    %3 = vector.load %arg2[%c0, %c0_1] : memref<16x128xf32, #tpu.memory_space<vmem>>, vector<16x128xf32>
    %c0_2 = arith.constant 0 : index
    %c0_3 = arith.constant 0 : index
    %4 = vector.load %arg3[%c0_2, %c0_3] : memref<16x128xf32, #tpu.memory_space<vmem>>, vector<16x128xf32>
    %5 = arith.mulf %3, %4 : vector<16x128xf32>
    %6 = arith.addf %3, %4 : vector<16x128xf32>
    %c0_4 = arith.constant 0 : index
    %c0_5 = arith.constant 0 : index
    %c0_6 = arith.constant 0 : index
    %c0_7 = arith.constant 0 : index
    %7 = vector.load %arg4[%c0_4, %c0_5, %c0_6, %c0_7] : memref<1x2x8x128xf32, #tpu.memory_space<vmem>>, vector<1x1x8x128xf32>
    %8 = vector.shape_cast %7 : vector<1x1x8x128xf32> to vector<8x128xf32>
    %9 = vector.shape_cast %5 : vector<16x128xf32> to vector<2x8x128xf32>
    %cst = arith.constant dense<0.000000e+00> : vector<8x128xf32>
    %10 = vector.multi_reduction <add>, %9, %cst [0] : vector<2x8x128xf32> to vector<8x128xf32>
    %11 = arith.addf %8, %10 : vector<8x128xf32>
    %c0_8 = arith.constant 0 : index
    %c0_9 = arith.constant 0 : index
    %c0_10 = arith.constant 0 : index
    %c0_11 = arith.constant 0 : index
    %12 = vector.load %arg4[%c0_8, %c0_9, %c0_10, %c0_11] : memref<1x2x8x128xf32, #tpu.memory_space<vmem>>, vector<1x1x8x128xf32>
    %13 = vector.shape_cast %12 : vector<1x1x8x128xf32> to vector<8x128xf32>
    %14 = vector.shape_cast %11 : vector<8x128xf32> to vector<1x1x8x128xf32>
    tpu.vector_store %arg4[%c0_8, %c0_9, %c0_10, %c0_11], %14 {strides = array<i32>} : memref<1x2x8x128xf32, #tpu.memory_space<vmem>>, vector<1x1x8x128xf32>,
    %c0_12 = arith.constant 0 : index
    %c1 = arith.constant 1 : index
    %c0_13 = arith.constant 0 : index
    %c0_14 = arith.constant 0 : index
    %15 = vector.load %arg4[%c0_12, %c1, %c0_13, %c0_14] : memref<1x2x8x128xf32, #tpu.memory_space<vmem>>, vector<1x1x8x128xf32>
    %16 = vector.shape_cast %15 : vector<1x1x8x128xf32> to vector<8x128xf32>
    %17 = vector.shape_cast %6 : vector<16x128xf32> to vector<2x8x128xf32>
    %cst_15 = arith.constant dense<0.000000e+00> : vector<8x128xf32>
    %18 = vector.multi_reduction <add>, %17, %cst_15 [0] : vector<2x8x128xf32> to vector<8x128xf32>
    %19 = arith.addf %16, %18 : vector<8x128xf32>
    %c0_16 = arith.constant 0 : index
    %c1_17 = arith.constant 1 : index
    %c0_18 = arith.constant 0 : index
    %c0_19 = arith.constant 0 : index
    %20 = vector.load %arg4[%c0_16, %c1_17, %c0_18, %c0_19] : memref<1x2x8x128xf32, #tpu.memory_space<vmem>>, vector<1x1x8x128xf32>
    %21 = vector.shape_cast %20 : vector<1x1x8x128xf32> to vector<8x128xf32>
    %22 = vector.shape_cast %19 : vector<8x128xf32> to vector<1x1x8x128xf32>
    tpu.vector_store %arg4[%c0_16, %c1_17, %c0_18, %c0_19], %22 {strides = array<i32>} : memref<1x2x8x128xf32, #tpu.memory_space<vmem>>, vector<1x1x8x128xf32>,
    return
  }
  func.func @transform_0(%arg0: i32, %arg1: i32) -> (i32, i32) {
    %c1_i32 = arith.constant 1 : i32
    %0 = arith.muli %arg0, %c1_i32 : i32
    %1 = arith.addi %0, %arg1 : i32
    %c0_i32 = arith.constant 0 : i32
    %2 = arith.minsi %1, %c0_i32 : i32
    %c0_i32_0 = arith.constant 0 : i32
    %c0_i32_1 = arith.constant 0 : i32
    return %2, %c0_i32_0 : i32, i32
  }
  func.func @transform_1(%arg0: i32, %arg1: i32) -> (i32, i32) {
    %c1_i32 = arith.constant 1 : i32
    %0 = arith.muli %arg0, %c1_i32 : i32
    %1 = arith.addi %0, %arg1 : i32
    %c0_i32 = arith.constant 0 : i32
    %2 = arith.minsi %1, %c0_i32 : i32
    %c0_i32_0 = arith.constant 0 : i32
    %c0_i32_1 = arith.constant 0 : i32
    return %2, %c0_i32_0 : i32, i32
  }
  func.func @transform_2(%arg0: i32, %arg1: i32) -> (i32, i32, i32, i32) {
    %c0_i32 = arith.constant 0 : i32
    %c0_i32_0 = arith.constant 0 : i32
    %c0_i32_1 = arith.constant 0 : i32
    %c0_i32_2 = arith.constant 0 : i32
    return %arg0, %c0_i32, %c0_i32_0, %c0_i32_1 : i32, i32, i32, i32
  }
}

</mosaic_0001>

<bundles_post_ra>
// kernel: tpu_custom_call.1
= control target key start
LH: loop header
LB: loop body
LE: loop exit
PB: predicated region body
PF: predicated region fallthrough
CT: control target
= control target key end

     0   :  { %7 = vsyncpa [#allocation3], 0  ;;  %s233_s0 = inlined_call_operand.hbm [shape: f32[16,128], index: 0, kind: input, shape index: {}]   ;;  %s234_s1 = inlined_call_operand.hbm [shape: f32[16,128], index: 1, kind: input, shape index: {}]   ;;  %s235_s2 = inlined_call_operand.hbm [shape: f32[1,2,8,128], index: 2, kind: output, shape index: {}]  }
   0x1   :  { %8 = vsyncpa [#allocation6], 0 }
   0x2   :  { %9 = vsyncpa [#allocation4], 0  ;;  %s20_s11 = sshll.u32 %s233_s0, 4  ;;  %s195_s12 = smov [#allocation2]   ;;  %s21_s11 = int_to_ptr.hbm [resolvable:$true] %s20_s11 }
   0x3   :  { %s22_s13 = sshll.u32 %s195_s12, 4  ;;  %s39_s16 = sshll.u32 %s234_s1, 4  ;;  %s23_s13 = int_to_ptr.vmem [resolvable:$true] %s22_s13  ;;  %s40_s16 = int_to_ptr.hbm [resolvable:$true] %s39_s16 }
   0x4   :  { %s196_s17 = smov 128   ;;  %s197_s18 = smov 8  }
   0x5   :  { %28 = dma.hbm_to_vmem [thread:$0]  %s21_s11, 256, %s23_s13, [#allocation3], %s196_s17, %s196_s17, %s197_s18  }
   0x6   :  { %s198_s19 = smov [#allocation5]  }
   0x7   :  { %s41_s20 = sshll.u32 %s198_s19, 4  ;;  %s42_s20 = int_to_ptr.vmem [resolvable:$true] %s41_s20 }
   0x8   :  { %47 = dma.hbm_to_vmem [thread:$0]  %s40_s16, 256, %s42_s20, [#allocation6], %s196_s17, %s196_s17, %s197_s18  }
   0x9   :  { %189 = dma.done.wait [#allocation3], 256  }
   0xa   :  { %190 = vsyncadd [#allocation3], 4294967040 }
   0xb   :  { %191 = dma.done.wait [#allocation6], 256  }
   0xc   :  { %192 = vsyncadd [#allocation6], 4294967040  ;;  %v70_v0 = vld [vmem:[#allocation2] sm:$0xff]  ;;  %v71_v1 = vld [vmem:[#allocation2 + $0x8] sm:$0xff]  ;;  %s199_s0 = smov [#allocation7]   ;;  %s93_s23 = sshll.u32 %s235_s2, 4  ;;  %s94_s23 = int_to_ptr.hbm [resolvable:$true] %s93_s23 }
   0xd   :  { %v72_v2 = vld [vmem:[#allocation5] sm:$0xff]  ;;  %v73_v3 = vld [vmem:[#allocation5 + $0x8] sm:$0xff]  ;;  %s91_s1 = sshll.u32 %s199_s0, 4  ;;  %s92_s1 = int_to_ptr.vmem [resolvable:$true] %s91_s1 }
   0xe   :  { %v74_v4 = vmul.f32 %v72_v2, %v70_v0  ;;  %v76_v5 = vadd.f32 %v72_v2, %v70_v0  ;;  %v75_v6 = vmul.f32 %v73_v3, %v71_v1  ;;  %v77_v7 = vadd.f32 %v73_v3, %v71_v1 }
  0x10   :  { %v79_v8 = vadd.f32 %v75_v6, %v74_v4  ;;  %v84_v9 = vadd.f32 %v77_v7, %v76_v5 }
  0x12   :  { %81 = vst [vmem:[#allocation7] sm:$0xff] %v79_v8 }
  0x13   :  { %86 = vst [vmem:[#allocation7 + $0x8] sm:$0xff] %v84_v9 }
  0x14   :  { %99 = dma.vmem_to_hbm [thread:$0]  %s92_s1, 256, %s94_s23, [#allocation4], %s196_s17, %s196_s17, %s197_s18  }
  0x15   :  { %193 = dma.done.wait [#allocation4], 256  }
  0x16   :  { %194 = vsyncadd [#allocation4], 4294967040 }
  0x17   :  { %104 = vsyncpa [#allocation3], 1 }
  0x18   :  { %105 = vsyncpa [#allocation6], 1 }
  0x19   :  { %106 = vsyncpa [#allocation4], 1 }

</bundles_post_ra>
